<compile_context>
chip_gen: v5e
topology: v5e:2x2
jax: 0.10.0
libtpu: 0.0.40
codegen_flags: <defaults>
</compile_context>

<pallas_src>
import functools

import jax
import jax.numpy as jnp
from jax.experimental import pallas as pl
from jax.experimental.pallas import tpu as pltpu

HID = 128  # lane-padded width for every layer (f32 vreg lane count)


def _round_up(n, m):
    return ((n + m - 1) // m) * m


def _mlp_kernel(x_ref, w_ref, b_ref, o_ref):
    # x_ref: (TB, 128)      batch tile, features zero-padded past the real F.
    # w_ref: (5, 128, 128)  packed zero-padded weights; slab 4, row 0 = W5^T.
    # b_ref: (8, 128)       packed zero-padded biases (rows 0..4 used).
    # o_ref: (TB, 1)        output tile.
    h = x_ref[...]
    for layer in range(4):  # static unroll: 4 MXU matmuls + VPU bias/ReLU
        h = jnp.dot(h, w_ref[layer], preferred_element_type=jnp.float32)
        h = jnp.maximum(h + b_ref[layer:layer + 1, :], 0.0)
    # Final layer has out_features == 1 -> VPU multiply + lane reduction,
    # avoiding a 1-lane MXU pass. Padded lanes are zero on both operands.
    w5_row = w_ref[4][0:1, :]                  # (1, 128)
    b5 = b_ref[4:5, 0:1]                       # (1, 1)
    out = jnp.sum(h * w5_row, axis=-1, keepdims=True) + b5
    o_ref[...] = out.astype(o_ref.dtype)


def pack_params(params):
    """Pack 5 weight matrices + 5 biases into two lane-padded f32 slabs.

    Layers 1-4 go in as (128,128) zero-padded matrices (x @ W layout).
    Layer 5 (hl4 -> 1) is stored transposed as row 0 of slab 4 so the kernel
    can do a VPU reduction. Zero padding keeps the math exact.
    """
    w_packed = jnp.zeros((5, HID, HID), jnp.float32)
    b_packed = jnp.zeros((8, HID), jnp.float32)
    for i in range(1, 5):
        w = params[f"w{i}"]                    # (in_i, out_i)
        b = params[f"b{i}"]                    # (1, out_i)
        w_packed = w_packed.at[i - 1, :w.shape[0], :w.shape[1]].set(w)
        b_packed = b_packed.at[i - 1, :b.shape[1]].set(b[0])
    w5 = params["w5"]                          # (hl4, 1)
    b5 = params["b5"]                          # (1, 1)
    w_packed = w_packed.at[4, 0, :w5.shape[0]].set(w5[:, 0])
    b_packed = b_packed.at[4, 0].set(b5[0, 0])
    return w_packed, b_packed


@functools.partial(jax.jit, static_argnames=("block_batch",))
def simplenet4_forward(x, w_packed, b_packed, *, block_batch=256):
    """x: [B, F] float32. Returns [B, 1] float32."""
    B, F = x.shape
    assert F <= HID, "feature dim must fit in one 128-lane slab"

    # Batch tile: multiple of 8 sublanes; 256 rows per step for large B.
    TB = min(block_batch, _round_up(B, 8))
    B_pad = _round_up(B, TB)
    grid = (B_pad // TB,)

    # Zero-pad batch (to TB multiple) and features (to 128 lanes).
    x_pad = jnp.zeros((B_pad, HID), jnp.float32).at[:B, :F].set(x)

    cost = pl.CostEstimate(
        flops=2 * B_pad * (4 * HID * HID + HID),
        transcendentals=0,
        bytes_accessed=(x_pad.size + w_packed.size + b_packed.size + B_pad) * 4,
    )

    out = pl.pallas_call(
        _mlp_kernel,
        out_shape=jax.ShapeDtypeStruct((B_pad, 1), jnp.float32),
        grid=grid,
        in_specs=[
            pl.BlockSpec((TB, HID), lambda i: (i, 0)),          # x: streamed tiles
            pl.BlockSpec((5, HID, HID), lambda i: (0, 0, 0)),   # weights: resident
            pl.BlockSpec((8, HID), lambda i: (0, 0)),           # biases: resident
        ],
        out_specs=pl.BlockSpec((TB, 1), lambda i: (i, 0)),
        compiler_params=pltpu.CompilerParams(
            dimension_semantics=("parallel",),
            vmem_limit_bytes=4 << 20,
        ),
        cost_estimate=cost,
    )(x_pad, w_packed, b_packed)

    # TODO(synk): for very large B, a lane-dense (1, TB) output layout would
    # avoid masked single-lane stores; kept (B, 1) to match module semantics.
    return out[:B]


def init_params(key, number_of_features, hl1, hl2, hl3, hl4):
    """PyTorch-style init: U(-1/sqrt(fan_in), +1/sqrt(fan_in)); W stored [in, out]."""
    dims = [(number_of_features, hl1), (hl1, hl2), (hl2, hl3), (hl3, hl4), (hl4, 1)]
    params = {}
    for i, (fan_in, fan_out) in enumerate(dims, start=1):
        key, kw, kb = jax.random.split(key, 3)
        bound = 1.0 / jnp.sqrt(jnp.float32(fan_in))
        params[f"w{i}"] = jax.random.uniform(kw, (fan_in, fan_out), jnp.float32,
                                             minval=-bound, maxval=bound)
        params[f"b{i}"] = jax.random.uniform(kb, (1, fan_out), jnp.float32,
                                             minval=-bound, maxval=bound)
    return params


def reference_forward(x, params):
    h = jnp.maximum(x @ params["w1"] + params["b1"], 0.0)
    h = jnp.maximum(h @ params["w2"] + params["b2"], 0.0)
    h = jnp.maximum(h @ params["w3"] + params["b3"], 0.0)
    h = jnp.maximum(h @ params["w4"] + params["b4"], 0.0)
    return h @ params["w5"] + params["b5"]


if __name__ == "__main__":
    key = jax.random.PRNGKey(0)
    batch = 8
    number_of_features, hl1, hl2, hl3, hl4 = 32, 64, 64, 32, 16

    key, kx, kp = jax.random.split(key, 3)
    x = jax.random.normal(kx, (batch, number_of_features), jnp.float32)
    params = init_params(kp, number_of_features, hl1, hl2, hl3, hl4)
    w_packed, b_packed = pack_params(params)

    # Small-batch path (grid of 1).
    out = jax.block_until_ready(simplenet4_forward(x, w_packed, b_packed))
    ref = reference_forward(x, params)
    assert out.shape == (batch, 1), out.shape
    assert jnp.allclose(out, ref, atol=1e-5, rtol=1e-5), "mismatch vs JAX reference (B=8)"

    # Batched path: exercises grid > 1, resident weights, and batch padding.
    key, kx2 = jax.random.split(key)
    x2 = jax.random.normal(kx2, (200, number_of_features), jnp.float32)
    out2 = jax.block_until_ready(
        simplenet4_forward(x2, w_packed, b_packed, block_batch=64))
    ref2 = reference_forward(x2, params)
    assert out2.shape == (200, 1), out2.shape
    assert jnp.allclose(out2, ref2, atol=1e-5, rtol=1e-5), "mismatch vs JAX reference (B=200)"

    print("KERNEL_OK")
</pallas_src>

<mosaic_0001>
module attributes {stable_mosaic.version = 11 : i64} {
  func.func @_mlp_kernel(%arg0: i32, %arg1: memref<8x128xf32, #tpu.memory_space<vmem>>, %arg2: memref<5x128x128xf32, #tpu.memory_space<vmem>>, %arg3: memref<8x128xf32, #tpu.memory_space<vmem>>, %arg4: memref<8x1xf32, #tpu.memory_space<vmem>>) attributes {dimension_semantics = [#tpu.dimension_semantics<parallel>], iteration_bounds = array<i64: 1>, scalar_prefetch = 0 : i64, scratch_operands = 0 : i64, tpu.core_type = #tpu.core_type<tc>, window_params = [{transform_indices = @transform_0, window_bounds = array<i64: 8, 128>}, {pipeline_mode = #tpu.pipeline_mode<synchronous>, transform_indices = @transform_1, window_bounds = array<i64: 5, 128, 128>}, {pipeline_mode = #tpu.pipeline_mode<synchronous>, transform_indices = @transform_2, window_bounds = array<i64: 8, 128>}, {transform_indices = @transform_3, window_bounds = array<i64: 8, 1>}]} {
    %c0 = arith.constant 0 : index
    %c0_0 = arith.constant 0 : index
    %0 = vector.load %arg1[%c0, %c0_0] : memref<8x128xf32, #tpu.memory_space<vmem>>, vector<8x128xf32>
    %c0_1 = arith.constant 0 : index
    %c0_2 = arith.constant 0 : index
    %c0_3 = arith.constant 0 : index
    %1 = vector.load %arg2[%c0_1, %c0_2, %c0_3] : memref<5x128x128xf32, #tpu.memory_space<vmem>>, vector<1x128x128xf32>
    %2 = vector.shape_cast %1 : vector<1x128x128xf32> to vector<128x128xf32>
    %cst = arith.constant dense<0.000000e+00> : vector<8x128xf32>
    %3 = tpu.matmul %0, %2, %cst {dimension_numbers = #tpu.dot_dimension_numbers<[1], [0], [0], [1], [0, 0, 1, 1], [], []>} : vector<8x128xf32>, vector<128x128xf32>, vector<8x128xf32> -> vector<8x128xf32>
    %c0_4 = arith.constant 0 : index
    %c0_5 = arith.constant 0 : index
    %4 = vector.load %arg3[%c0_4, %c0_5] : memref<8x128xf32, #tpu.memory_space<vmem>>, vector<1x128xf32>
    %5 = vector.broadcast %4 : vector<1x128xf32> to vector<8x128xf32>
    %6 = arith.addf %3, %5 : vector<8x128xf32>
    %cst_6 = arith.constant 0.000000e+00 : f32
    %7 = vector.broadcast %cst_6 : f32 to vector<8x128xf32>
    %8 = arith.maximumf %6, %7 : vector<8x128xf32>
    %c1 = arith.constant 1 : index
    %c0_7 = arith.constant 0 : index
    %c0_8 = arith.constant 0 : index
    %9 = vector.load %arg2[%c1, %c0_7, %c0_8] : memref<5x128x128xf32, #tpu.memory_space<vmem>>, vector<1x128x128xf32>
    %10 = vector.shape_cast %9 : vector<1x128x128xf32> to vector<128x128xf32>
    %cst_9 = arith.constant dense<0.000000e+00> : vector<8x128xf32>
    %11 = tpu.matmul %8, %10, %cst_9 {dimension_numbers = #tpu.dot_dimension_numbers<[1], [0], [0], [1], [0, 0, 1, 1], [], []>} : vector<8x128xf32>, vector<128x128xf32>, vector<8x128xf32> -> vector<8x128xf32>
    %c1_10 = arith.constant 1 : index
    %c0_11 = arith.constant 0 : index
    %12 = vector.load %arg3[%c1_10, %c0_11] : memref<8x128xf32, #tpu.memory_space<vmem>>, vector<1x128xf32>
    %13 = vector.broadcast %12 : vector<1x128xf32> to vector<8x128xf32>
    %14 = arith.addf %11, %13 : vector<8x128xf32>
    %cst_12 = arith.constant 0.000000e+00 : f32
    %15 = vector.broadcast %cst_12 : f32 to vector<8x128xf32>
    %16 = arith.maximumf %14, %15 : vector<8x128xf32>
    %c2 = arith.constant 2 : index
    %c0_13 = arith.constant 0 : index
    %c0_14 = arith.constant 0 : index
    %17 = vector.load %arg2[%c2, %c0_13, %c0_14] : memref<5x128x128xf32, #tpu.memory_space<vmem>>, vector<1x128x128xf32>
    %18 = vector.shape_cast %17 : vector<1x128x128xf32> to vector<128x128xf32>
    %cst_15 = arith.constant dense<0.000000e+00> : vector<8x128xf32>
    %19 = tpu.matmul %16, %18, %cst_15 {dimension_numbers = #tpu.dot_dimension_numbers<[1], [0], [0], [1], [0, 0, 1, 1], [], []>} : vector<8x128xf32>, vector<128x128xf32>, vector<8x128xf32> -> vector<8x128xf32>
    %c2_16 = arith.constant 2 : index
    %c0_17 = arith.constant 0 : index
    %20 = vector.load %arg3[%c2_16, %c0_17] : memref<8x128xf32, #tpu.memory_space<vmem>>, vector<1x128xf32>
    %21 = vector.broadcast %20 : vector<1x128xf32> to vector<8x128xf32>
    %22 = arith.addf %19, %21 : vector<8x128xf32>
    %cst_18 = arith.constant 0.000000e+00 : f32
    %23 = vector.broadcast %cst_18 : f32 to vector<8x128xf32>
    %24 = arith.maximumf %22, %23 : vector<8x128xf32>
    %c3 = arith.constant 3 : index
    %c0_19 = arith.constant 0 : index
    %c0_20 = arith.constant 0 : index
    %25 = vector.load %arg2[%c3, %c0_19, %c0_20] : memref<5x128x128xf32, #tpu.memory_space<vmem>>, vector<1x128x128xf32>
    %26 = vector.shape_cast %25 : vector<1x128x128xf32> to vector<128x128xf32>
    %cst_21 = arith.constant dense<0.000000e+00> : vector<8x128xf32>
    %27 = tpu.matmul %24, %26, %cst_21 {dimension_numbers = #tpu.dot_dimension_numbers<[1], [0], [0], [1], [0, 0, 1, 1], [], []>} : vector<8x128xf32>, vector<128x128xf32>, vector<8x128xf32> -> vector<8x128xf32>
    %c3_22 = arith.constant 3 : index
    %c0_23 = arith.constant 0 : index
    %28 = vector.load %arg3[%c3_22, %c0_23] : memref<8x128xf32, #tpu.memory_space<vmem>>, vector<1x128xf32>
    %29 = vector.broadcast %28 : vector<1x128xf32> to vector<8x128xf32>
    %30 = arith.addf %27, %29 : vector<8x128xf32>
    %cst_24 = arith.constant 0.000000e+00 : f32
    %31 = vector.broadcast %cst_24 : f32 to vector<8x128xf32>
    %32 = arith.maximumf %30, %31 : vector<8x128xf32>
    %c4 = arith.constant 4 : index
    %c0_25 = arith.constant 0 : index
    %c0_26 = arith.constant 0 : index
    %33 = vector.load %arg2[%c4, %c0_25, %c0_26] : memref<5x128x128xf32, #tpu.memory_space<vmem>>, vector<1x128x128xf32>
    %34 = vector.shape_cast %33 : vector<1x128x128xf32> to vector<128x128xf32>
    %35 = vector.extract_strided_slice %34 {offsets = [0, 0], sizes = [1, 128], strides = [1, 1]} : vector<128x128xf32> to vector<1x128xf32>
    %c4_27 = arith.constant 4 : index
    %c0_28 = arith.constant 0 : index
    %36 = vector.load %arg3[%c4_27, %c0_28] : memref<8x128xf32, #tpu.memory_space<vmem>>, vector<1x1xf32>
    %37 = vector.broadcast %35 : vector<1x128xf32> to vector<8x128xf32>
    %38 = arith.mulf %32, %37 : vector<8x128xf32>
    %cst_29 = arith.constant dense<0.000000e+00> : vector<8xf32>
    %39 = vector.multi_reduction <add>, %38, %cst_29 [1] : vector<8x128xf32> to vector<8xf32>
    %40 = vector.shape_cast %39 : vector<8xf32> to vector<8x1xf32>
    %41 = vector.broadcast %36 : vector<1x1xf32> to vector<8x1xf32>
    %42 = arith.addf %40, %41 : vector<8x1xf32>
    %c0_30 = arith.constant 0 : index
    %c0_31 = arith.constant 0 : index
    %43 = vector.load %arg4[%c0_30, %c0_31] : memref<8x1xf32, #tpu.memory_space<vmem>>, vector<8x1xf32>
    tpu.vector_store %arg4[%c0_30, %c0_31], %42 {strides = array<i32>} : memref<8x1xf32, #tpu.memory_space<vmem>>, vector<8x1xf32>,
    return
  }
  func.func @transform_0(%arg0: i32) -> (i32, i32) {
    %c0_i32 = arith.constant 0 : i32
    %c0_i32_0 = arith.constant 0 : i32
    return %arg0, %c0_i32 : i32, i32
  }
  func.func @transform_1(%arg0: i32) -> (i32, i32, i32) {
    %c0_i32 = arith.constant 0 : i32
    %c0_i32_0 = arith.constant 0 : i32
    %c0_i32_1 = arith.constant 0 : i32
    %c0_i32_2 = arith.constant 0 : i32
    return %c0_i32, %c0_i32_0, %c0_i32_1 : i32, i32, i32
  }
  func.func @transform_2(%arg0: i32) -> (i32, i32) {
    %c0_i32 = arith.constant 0 : i32
    %c0_i32_0 = arith.constant 0 : i32
    %c0_i32_1 = arith.constant 0 : i32
    return %c0_i32, %c0_i32_0 : i32, i32
  }
  func.func @transform_3(%arg0: i32) -> (i32, i32) {
    %c0_i32 = arith.constant 0 : i32
    %c0_i32_0 = arith.constant 0 : i32
    return %arg0, %c0_i32 : i32, i32
  }
}

</mosaic_0001>

<bundles_post_ra>
// kernel: simplenet4_forward.1
= control target key start
LH: loop header
LB: loop body
LE: loop exit
PB: predicated region body
PF: predicated region fallthrough
CT: control target
= control target key end

     0   :  { %8 = vsyncpa [#allocation3], 0  ;;  %s240_s15 = smov [#allocation2]   ;;  %s241_s17 = smov 128   ;;  %s287_s0 = inlined_call_operand.vmem [shape: f32[8,128], index: 0, kind: input, shape index: {}]   ;;  %s288_s1 = inlined_call_operand.hbm [shape: f32[5,128,128], index: 1, kind: input, shape index: {}]   ;;  %s289_s2 = inlined_call_operand.vmem [shape: f32[8,128], index: 2, kind: input, shape index: {}]   ;;  %s290_s3 = inlined_call_operand.vmem [shape: f32[8,1], index: 3, kind: output, shape index: {}]  }
   0x1   :  { %s15_s14 = sshll.u32 %s288_s1, 4  ;;  %s17_s16 = sshll.u32 %s240_s15, 4  ;;  %s16_s14 = int_to_ptr.hbm [resolvable:$true] %s15_s14  ;;  %s18_s16 = int_to_ptr.vmem [resolvable:$true] %s17_s16 }
   0x2   :  { %s242_s18 = smov 8  }
   0x3   :  { %23 = dma.hbm_to_vmem [thread:$0]  %s16_s14, 10240, %s18_s16, [#allocation3], %s241_s17, %s241_s17, %s242_s18  }
   0x4   :  { %238 = dma.done.wait [#allocation3], 10240  }
   0x5   :  { %239 = vsyncadd [#allocation3], 4294957056  ;;  %v46_v0 = vld [vmem:[#allocation2 + $0x78] sm:$0xff]  ;;  %v45_v1 = vld [vmem:[#allocation2 + $0x70] sm:$0xff]  ;;  %vm199_vm0 = vcmask 7168  }
   0x6   :  { %49 = vmatpush.msra.mxu0 %v46_v0  ;;  %v44_v2 = vld [vmem:[#allocation2 + $0x68] sm:$0xff]  ;;  %v43_v3 = vld [vmem:[#allocation2 + $0x60] sm:$0xff]  ;;  %v86_v4 = vld [vmem:[#allocation2 + $0xf8] sm:$0xff] }
   0x7   :  { %v42_v5 = vld [vmem:[#allocation2 + $0x58] sm:$0xff]  ;;  %89 = vmatpush.msra.mxu1 %v86_v4  ;;  %v85_v6 = vld [vmem:[#allocation2 + $0xf0] sm:$0xff]  ;;  %v84_v7 = vld [vmem:[#allocation2 + $0xe8] sm:$0xff] }
   0x8   :  { %50 = vmatpush.msra.mxu0 %v45_v1  ;;  %v41_v8 = vld [vmem:[#allocation2 + $0x50] sm:$0xff]  ;;  %v40_v9 = vld [vmem:[#allocation2 + $0x48] sm:$0xff]  ;;  %v83_v10 = vld [vmem:[#allocation2 + $0xe0] sm:$0xff] }
   0x9   :  { %90 = vmatpush.msra.mxu1 %v85_v6  ;;  %v82_v11 = vld [vmem:[#allocation2 + $0xd8] sm:$0xff]  ;;  %v39_v12 = vld [vmem:[#allocation2 + $0x40] sm:$0xff]  ;;  %v81_v13 = vld [vmem:[#allocation2 + $0xd0] sm:$0xff] }
   0xa   :  { %51 = vmatpush.msra.mxu0 %v44_v2  ;;  %v38_v14 = vld [vmem:[#allocation2 + $0x38] sm:$0xff]  ;;  %v80_v15 = vld [vmem:[#allocation2 + $0xc8] sm:$0xff]  ;;  %v37_v16 = vld [vmem:[#allocation2 + $0x30] sm:$0xff] }
   0xb   :  { %91 = vmatpush.msra.mxu1 %v84_v7  ;;  %v79_v17 = vld [vmem:[#allocation2 + $0xc0] sm:$0xff]  ;;  %v36_v18 = vld [vmem:[#allocation2 + $0x28] sm:$0xff]  ;;  %v78_v19 = vld [vmem:[#allocation2 + $0xb8] sm:$0xff] }
   0xc   :  { %52 = vmatpush.msra.mxu0 %v43_v3  ;;  %v35_v20 = vld [vmem:[#allocation2 + $0x20] sm:$0xff]  ;;  %v77_v21 = vld [vmem:[#allocation2 + $0xb0] sm:$0xff]  ;;  %v34_v22 = vld [vmem:[#allocation2 + $0x18] sm:$0xff] }
   0xd   :  { %92 = vmatpush.msra.mxu1 %v83_v10  ;;  %v76_v23 = vld [vmem:[#allocation2 + $0xa8] sm:$0xff]  ;;  %v33_v24 = vld [vmem:[#allocation2 + $0x10] sm:$0xff]  ;;  %v75_v25 = vld [vmem:[#allocation2 + $0xa0] sm:$0xff] }
   0xe   :  { %53 = vmatpush.msra.mxu0 %v42_v5  ;;  %v32_v26 = vld [vmem:[#allocation2 + $0x8] sm:$0xff]  ;;  %v74_v27 = vld [vmem:[#allocation2 + $0x98] sm:$0xff]  ;;  %v31_v28 = vld [vmem:[#allocation2] sm:$0xff] }
   0xf   :  { %93 = vmatpush.msra.mxu1 %v82_v11  ;;  %v30_v29 = vld [vmem:[%s287_s0] sm:$0xff]  ;;  %v73_v30 = vld [vmem:[#allocation2 + $0x90] sm:$0xff]  ;;  %v72_v31 = vld [vmem:[#allocation2 + $0x88] sm:$0xff] }
  0x10   :  { %54 = vmatpush.msra.mxu0 %v41_v8  ;;  %v71_v32 = vld [vmem:[#allocation2 + $0x80] sm:$0xff]  ;;  %v126_v33 = vld [vmem:[#allocation2 + $0x178] sm:$0xff]  ;;  %v125_v34 = vld [vmem:[#allocation2 + $0x170] sm:$0xff] }
  0x11   :  { %94 = vmatpush.msra.mxu1 %v81_v13  ;;  %129 = vmatpush.msra.mxu2 %v126_v33  ;;  %v124_v35 = vld [vmem:[#allocation2 + $0x168] sm:$0xff]  ;;  %v123_v36 = vld [vmem:[#allocation2 + $0x160] sm:$0xff]  ;;  %v122_v37 = vld [vmem:[#allocation2 + $0x158] sm:$0xff] }
  0x12   :  { %55 = vmatpush.msra.mxu0 %v40_v9  ;;  %v121_v38 = vld [vmem:[#allocation2 + $0x150] sm:$0xff]  ;;  %v120_v39 = vld [vmem:[#allocation2 + $0x148] sm:$0xff]  ;;  %v119_v40 = vld [vmem:[#allocation2 + $0x140] sm:$0xff] }
  0x13   :  { %95 = vmatpush.msra.mxu1 %v80_v15  ;;  %130 = vmatpush.msra.mxu2 %v125_v34  ;;  %v118_v41 = vld [vmem:[#allocation2 + $0x138] sm:$0xff]  ;;  %v117_v42 = vld [vmem:[#allocation2 + $0x130] sm:$0xff]  ;;  %v116_v43 = vld [vmem:[#allocation2 + $0x128] sm:$0xff] }
  0x14   :  { %56 = vmatpush.msra.mxu0 %v39_v12  ;;  %v115_v44 = vld [vmem:[#allocation2 + $0x120] sm:$0xff]  ;;  %v114_v45 = vld [vmem:[#allocation2 + $0x118] sm:$0xff]  ;;  %v113_v50 = vld [vmem:[#allocation2 + $0x110] sm:$0xff] }
  0x15   :  { %96 = vmatpush.msra.mxu1 %v79_v17  ;;  %131 = vmatpush.msra.mxu2 %v124_v35  ;;  %v209_v46 = vld [vmem:[%s289_s2] ss:$0 sm:$0xff]  ;;  %v112_v51 = vld [vmem:[#allocation2 + $0x108] sm:$0xff]  ;;  %v166_v53 = vld [vmem:[#allocation2 + $0x1f8] sm:$0xff] }
  0x16   :  { %57 = vmatpush.msra.mxu0 %v38_v14  ;;  %v111_v52 = vld [vmem:[#allocation2 + $0x100] sm:$0xff]  ;;  %v165_v54 = vld [vmem:[#allocation2 + $0x1f0] sm:$0xff]  ;;  %169 = vmatpush.msra.mxu3 %v166_v53  ;;  %v164_v55 = vld [vmem:[#allocation2 + $0x1e8] sm:$0xff] }
  0x17   :  { %97 = vmatpush.msra.mxu1 %v78_v19  ;;  %132 = vmatpush.msra.mxu2 %v123_v36  ;;  %v163_v56 = vld [vmem:[#allocation2 + $0x1e0] sm:$0xff]  ;;  %v162_v57 = vld [vmem:[#allocation2 + $0x1d8] sm:$0xff]  ;;  %v161_v58 = vld [vmem:[#allocation2 + $0x1d0] sm:$0xff] }
  0x18   :  { %58 = vmatpush.msra.mxu0 %v37_v16  ;;  %170 = vmatpush.msra.mxu3 %v165_v54  ;;  %v160_v59 = vld [vmem:[#allocation2 + $0x1c8] sm:$0xff]  ;;  %v159_v60 = vld [vmem:[#allocation2 + $0x1c0] sm:$0xff]  ;;  %v158_v61 = vld [vmem:[#allocation2 + $0x1b8] sm:$0xff] }
  0x19   :  { %98 = vmatpush.msra.mxu1 %v77_v21  ;;  %133 = vmatpush.msra.mxu2 %v122_v37  ;;  %v157_v62 = vld [vmem:[#allocation2 + $0x1b0] sm:$0xff]  ;;  %v156_v63 = vld [vmem:[#allocation2 + $0x1a8] sm:$0xff]  ;;  %v155_v0 = vld [vmem:[#allocation2 + $0x1a0] sm:$0xff] }
  0x1a   :  { %59 = vmatpush.msra.mxu0 %v36_v18  ;;  %171 = vmatpush.msra.mxu3 %v164_v55  ;;  %v154_v1 = vld [vmem:[#allocation2 + $0x198] sm:$0xff]  ;;  %v210_v2 = vld [vmem:[%s289_s2 + $0x1] ss:$0 sm:$0xff]  ;;  %v153_v6 = vld [vmem:[#allocation2 + $0x190] sm:$0xff] }
  0x1b   :  { %99 = vmatpush.msra.mxu1 %v76_v23  ;;  %134 = vmatpush.msra.mxu2 %v121_v38  ;;  %v152_v7 = vld [vmem:[#allocation2 + $0x188] sm:$0xff]  ;;  %v151_v8 = vld [vmem:[#allocation2 + $0x180] sm:$0xff] }
  0x1c   :  { %60 = vmatpush.msra.mxu0 %v35_v20  ;;  %172 = vmatpush.msra.mxu3 %v163_v56  ;;  %v211_v9 = vld [vmem:[%s289_s2 + $0x2] ss:$0 sm:$0xff]  ;;  %v212_v13 = vld [vmem:[%s289_s2 + $0x3] ss:$0 sm:$0xff]  ;;  %v213_v20 = vld [vmem:[%s289_s2 + $0x4] ss:$0 sm:$0xff] }
  0x1d   :  { %100 = vmatpush.msra.mxu1 %v75_v25  ;;  %135 = vmatpush.msra.mxu2 %v120_v39  ;;  %v191_v14 = vld [vmem:[#allocation2 + $0x200] sm:$0xff] }
  0x1e   :  { %61 = vmatpush.msra.mxu0 %v34_v22  ;;  %173 = vmatpush.msra.mxu3 %v162_v57  ;;  %v193_v17 = vperm.slane %v191_v14, 0 }
  0x1f   :  { %101 = vmatpush.msra.mxu1 %v74_v27  ;;  %136 = vmatpush.msra.mxu2 %v119_v40 }
  0x20   :  { %62 = vmatpush.msra.mxu0 %v33_v24  ;;  %174 = vmatpush.msra.mxu3 %v161_v58 }
  0x21   :  { %102 = vmatpush.msra.mxu1 %v73_v30  ;;  %137 = vmatpush.msra.mxu2 %v118_v41 }
  0x22   :  { %63 = vmatpush.msra.mxu0 %v32_v26  ;;  %175 = vmatpush.msra.mxu3 %v160_v59 }
  0x23   :  { %103 = vmatpush.msra.mxu1 %v72_v31  ;;  %138 = vmatpush.msra.mxu2 %v117_v42 }
  0x24   :  { %64 = vmatpush.msra.mxu0 %v31_v28  ;;  %176 = vmatpush.msra.mxu3 %v159_v60 }
  0x25   :  { %65 = vmatmul.f32.vlgmr.msra.gmra.mxu0 %v30_v29  ;;  %104 = vmatpush.msra.mxu1 %v71_v32 }
  0x26   :  { %139 = vmatpush.msra.mxu2 %v116_v43  ;;  %177 = vmatpush.msra.mxu3 %v158_v61 }
  0x28   :  { %140 = vmatpush.msra.mxu2 %v115_v44  ;;  %178 = vmatpush.msra.mxu3 %v157_v62 }
  0x2a   :  { %141 = vmatpush.msra.mxu2 %v114_v45  ;;  %179 = vmatpush.msra.mxu3 %v156_v63 }
  0x2c   :  { %142 = vmatpush.msra.mxu2 %v113_v50  ;;  %180 = vmatpush.msra.mxu3 %v155_v0 }
  0x2e   :  { %143 = vmatpush.msra.mxu2 %v112_v51  ;;  %181 = vmatpush.msra.mxu3 %v154_v1 }
  0x30   :  { %144 = vmatpush.msra.mxu2 %v111_v52  ;;  %182 = vmatpush.msra.mxu3 %v153_v6 }
  0x32   :  { %183 = vmatpush.msra.mxu3 %v152_v7 }
  0x34   :  { %184 = vmatpush.msra.mxu3 %v151_v8 }
  0xa2   :  { %v66_v47 = vpop.f32.mrf.mxu0 }
  0xa3   :  { %v67_v48 = vadd.f32 %v209_v46, %v66_v47 }
  0xa5   :  { %v69_v49 = vmax.f32 %v67_v48, 0.0 }
  0xa7   :  { %105 = vmatmul.f32.vlgmr.msra.gmra.mxu1 %v69_v49 }
 0x124   :  { %v106_v3 = vpop.f32.mrf.mxu1 }
 0x125   :  { %v107_v4 = vadd.f32 %v210_v2, %v106_v3 }
 0x127   :  { %v109_v5 = vmax.f32 %v107_v4, 0.0 }
 0x129   :  { %145 = vmatmul.f32.vlgmr.msra.gmra.mxu2 %v109_v5 }
 0x1ac   :  { %v146_v10 = vpop.f32.mrf.mxu2 }
 0x1ad   :  { %v147_v11 = vadd.f32 %v211_v9, %v146_v10 }
 0x1af   :  { %v149_v12 = vmax.f32 %v147_v11, 0.0 }
 0x1b1   :  { %185 = vmatmul.f32.vlgmr.msra.gmra.mxu3 %v149_v12 }
 0x234   :  { %v186_v15 = vpop.f32.mrf.mxu3 }
 0x235   :  { %v187_v16 = vadd.f32 %v212_v13, %v186_v15 }
 0x237   :  { %v189_v18 = vmax.f32 %v187_v16, 0.0 }
 0x239   :  { %v194_v19 = vmul.f32 %v193_v17, %v189_v18 }
 0x23b   :  { %195 = vadd.xlane.f32.xlu0 %v194_v19 }
 0x2ae   :  { %v196_v21 = vpop.xlane.xlu0 %195 }
 0x2af   :  { %v198_v22 = vadd.f32 %v213_v20, %v196_v21 }
 0x2b1   :  { %200 = vst.msk [vmem:[%s290_s3] sm:$0xff] %vm199_vm0, %v198_v22 }
 0x2b2   :  { %205 = vsyncpa [#allocation3], 1 }

</bundles_post_ra>
